<compile_context>
chip_gen: v5e
topology: v5e:2x2
jax: 0.10.0
libtpu: 0.0.40
codegen_flags: <defaults>
</compile_context>

<pallas_src>
import functools

import jax
import jax.numpy as jnp
from jax.experimental import pallas as pl
from jax.experimental.pallas import tpu as pltpu

LANE = 128


def _round_up(n, m=LANE):
    return ((n + m - 1) // m) * m


def _pick_batch_tile(b, s, *, target_rows=512, max_rows=1024, min_steps=4, min_rows=256):
    """Batch items per grid step.

    Targets bt*S rows per block in roughly [256, 1024] so MXU rows are filled while the
    ~6x (M, dq) f32 intermediates stay well inside v7x's 64 MiB VMEM, and prefers
    >= min_steps grid steps (software pipelining + v7x megacore sharding) as long as
    each step still keeps >= min_rows rows.  Small batches collapse to one grid step
    (v5e/v6e single-TC case), avoiding per-step pipeline overhead.
    """
    s = max(s, 1)
    cap = max(1, max_rows // s)                       # VMEM cap: bt*S <= max_rows
    bt = max(1, min(b, cap, max(1, target_rows // s)))
    while -(-b // bt) < min_steps and bt > 1 and (bt // 2) * s >= min_rows:
        bt //= 2
    return bt


def _feature_enhancer_kernel(
    x_ref, noise_ref,
    wqkv_ref, bqkv_ref,
    we1_ref, be1_ref, we2_ref, be2_ref,
    wd1_ref, bd1_ref, wd2_ref, bd2_ref,
    wfc_ref, bfc_ref,
    o_ref,
    *, bt, sp, seq, d_in, dq, cdt,
):
    m = bt * sp

    def mm(a, w_ref):
        # Activation operand cast once per stage to the matmul dtype; f32 accumulation.
        return jnp.dot(a.astype(cdt), w_ref[...], preferred_element_type=jnp.float32)

    # add_noise, then flatten (bt, Sp, D) -> (bt*Sp, D) for all Linear layers.
    x = x_ref[...] + noise_ref[...]
    x2 = x.reshape(m, d_in)

    # --- SelfAttention: fused QKV projection (one MXU matmul, 128-aligned out slabs) ---
    qkv = mm(x2, wqkv_ref) + bqkv_ref[...]                               # (M, 3*dq) f32
    q = qkv[:, 0 * dq:1 * dq].reshape(bt, sp, dq)                        # 1/sqrt(D) pre-folded
    k = qkv[:, 1 * dq:2 * dq].reshape(bt, sp, dq)
    v = qkv[:, 2 * dq:3 * dq].reshape(bt, sp, dq)

    # scores = (Q/sqrt(D)) K^T : contract last dims directly, no explicit transpose.
    scores = jnp.einsum("bqd,bkd->bqk", q.astype(cdt), k.astype(cdt),
                        preferred_element_type=jnp.float32)              # (bt, Sp, Sp)
    if sp > seq:  # sequence was padded to a sublane multiple: mask the pad keys
        key_idx = jax.lax.broadcasted_iota(jnp.int32, (1, 1, sp), 2)
        scores = jnp.where(key_idx < seq, scores, -1e30)
    mx = jnp.max(scores, axis=-1, keepdims=True)
    e = jnp.exp(scores - mx)
    denom = jnp.sum(e, axis=-1, keepdims=True)
    attn = e * pl.reciprocal(denom, approx=True)                         # softmax (EUP rcp)
    enhanced = jnp.einsum("bqk,bkd->bqd", attn.astype(cdt), v.astype(cdt),
                          preferred_element_type=jnp.float32)            # (bt, Sp, dq)
    h = enhanced.reshape(m, dq)

    # --- DenoisingAutoencoder on the flattened (M, .) matrix ---
    h = jnp.maximum(mm(h, we1_ref) + be1_ref[...], 0.0)                  # (M, 128) ReLU
    h = jnp.maximum(mm(h, we2_ref) + be2_ref[...], 0.0)                  # (M, 128) ReLU (64 real)
    h = jnp.maximum(mm(h, wd1_ref) + bd1_ref[...], 0.0)                  # (M, 128) ReLU
    h = jax.nn.sigmoid(mm(h, wd2_ref) + bd2_ref[...])                    # (M, dq) Sigmoid

    # --- final fc: zero pad-rows of wfc absorb the sigmoid(0)=0.5 pad lanes ---
    out = mm(h, wfc_ref) + bfc_ref[...]                                  # (M, D) f32
    o_ref[...] = out.reshape(bt, sp, d_in)


def prepare_params(params, input_dim, *, use_bf16=True):
    """One-time weight repacking (pad / fuse / fold scale / cast).  Call once, reuse."""
    D = input_dim
    dq = _round_up(D)
    scale = 1.0 / float(D) ** 0.5
    cdt = jnp.bfloat16 if use_bf16 else jnp.float32

    def pad2(w, rows, cols):
        out = jnp.zeros((rows, cols), jnp.float32)
        return out.at[: w.shape[0], : w.shape[1]].set(w.astype(jnp.float32))

    # Fused QKV: in-dim stays the real D (activations are not padded); each of q/k/v gets
    # its own 128-aligned output slab.  1/sqrt(D) is folded into the q slab + bias.
    wqkv = jnp.zeros((D, 3 * dq), jnp.float32)
    wqkv = wqkv.at[:, 0 * dq:0 * dq + D].set(params["wq"] * scale)
    wqkv = wqkv.at[:, 1 * dq:1 * dq + D].set(params["wk"])
    wqkv = wqkv.at[:, 2 * dq:2 * dq + D].set(params["wv"])
    bqkv = jnp.zeros((1, 3 * dq), jnp.float32)
    bqkv = bqkv.at[:, 0 * dq:0 * dq + D].set(params["bq"] * scale)
    bqkv = bqkv.at[:, 1 * dq:1 * dq + D].set(params["bk"])
    bqkv = bqkv.at[:, 2 * dq:2 * dq + D].set(params["bv"])

    we1 = pad2(params["we1"], dq, 128);   be1 = pad2(params["be1"], 1, 128)
    we2 = pad2(params["we2"], 128, 128);  be2 = pad2(params["be2"], 1, 128)
    wd1 = pad2(params["wd1"], 128, 128);  bd1 = pad2(params["bd1"], 1, 128)
    wd2 = pad2(params["wd2"], 128, dq);   bd2 = pad2(params["bd2"], 1, dq)
    # fc: in-rows D..dq are zero (absorb sigmoid pad lanes); out-dim stays the real D.
    wfc = pad2(params["wfc"], dq, D)
    bfc = params["bfc"].astype(jnp.float32).reshape(1, D)

    return (wqkv.astype(cdt), bqkv,
            we1.astype(cdt), be1, we2.astype(cdt), be2,
            wd1.astype(cdt), bd1, wd2.astype(cdt), bd2,
            wfc.astype(cdt), bfc)


def feature_enhancer(x, noise, prepared):
    """x, noise: (B, S, D) float32. prepared: output of prepare_params()."""
    B, S, D = x.shape
    cdt = prepared[0].dtype
    dq = _round_up(D)

    sp = _round_up(S, 8)                       # keep reshapes sublane-layout-preserving
    bt = _pick_batch_tile(B, sp)
    grid = -(-B // bt)
    Bp = grid * bt                             # pad B so bt need not divide it

    if sp != S or Bp != B:
        pad = ((0, Bp - B), (0, sp - S), (0, 0))
        xp = jnp.pad(x, pad)
        np_ = jnp.pad(noise, pad)
    else:
        xp, np_ = x, noise

    act_spec = pl.BlockSpec((bt, sp, D), lambda b: (b, 0, 0))

    def full_spec(arr):
        nd = arr.ndim
        # Constant index map: weights fetched once, stay VMEM-resident across steps.
        return pl.BlockSpec(arr.shape, lambda b, _nd=nd: (0,) * _nd)

    in_specs = [act_spec, act_spec] + [full_spec(w) for w in prepared]

    kernel = functools.partial(
        _feature_enhancer_kernel, bt=bt, sp=sp, seq=S, d_in=D, dq=dq, cdt=cdt)

    # Advisory cost estimate (helps XLA schedule surrounding ops around the custom call).
    mt = Bp * sp
    flops = int(2 * mt * (D * 3 * dq)
                + 4 * Bp * sp * sp * dq
                + 2 * mt * (dq * 128 + 128 * 128 + 128 * 128 + 128 * dq)
                + 2 * mt * (dq * D))
    transcendentals = int(Bp * sp * sp + mt * dq)
    bytes_accessed = int(4 * 3 * Bp * sp * D
                         + sum(w.size * w.dtype.itemsize for w in prepared))

    out = pl.pallas_call(
        kernel,
        out_shape=jax.ShapeDtypeStruct((Bp, sp, D), jnp.float32),
        grid_spec=pltpu.PrefetchScalarGridSpec(
            num_scalar_prefetch=0,
            grid=(grid,),
            in_specs=in_specs,
            out_specs=pl.BlockSpec((bt, sp, D), lambda b: (b, 0, 0)),
        ),
        compiler_params=pltpu.CompilerParams(
            dimension_semantics=("parallel",),
        ),
        cost_estimate=pl.CostEstimate(
            flops=flops,
            transcendentals=transcendentals,
            bytes_accessed=bytes_accessed,
        ),
    )(xp, np_, *prepared)

    if sp != S or Bp != B:
        out = out[:B, :S, :]
    return out


def init_params(key, input_dim):
    """Deterministic synthetic parameters, stored as (in, out) weights / (1, out) biases."""
    dims = {
        "q": (input_dim, input_dim),
        "k": (input_dim, input_dim),
        "v": (input_dim, input_dim),
        "e1": (input_dim, 128),
        "e2": (128, 64),
        "d1": (64, 128),
        "d2": (128, input_dim),
        "fc": (input_dim, input_dim),
    }
    params = {}
    for i, (name, (din, dout)) in enumerate(dims.items()):
        kw, kb = jax.random.split(jax.random.fold_in(key, i))
        bound = 1.0 / (din ** 0.5)  # matches nn.Linear default init range
        params["w" + name] = jax.random.uniform(kw, (din, dout), jnp.float32, -bound, bound)
        params["b" + name] = jax.random.uniform(kb, (1, dout), jnp.float32, -bound, bound)
    return params


if __name__ == "__main__":
    B, S, D = 2, 8, 32
    noise_level = 0.1

    key = jax.random.PRNGKey(0)
    kx, knoise, kparam = jax.random.split(key, 3)

    x = jax.random.normal(kx, (B, S, D), jnp.float32)
    # add_noise: randn_like(x) * noise_level (deterministic here via fixed key).
    noise = jax.random.normal(knoise, (B, S, D), jnp.float32) * noise_level
    params = init_params(kparam, D)

    # Pure-JAX reference.
    def ref(x, noise, p):
        nx = x + noise
        q = nx @ p["wq"] + p["bq"]
        k = nx @ p["wk"] + p["bk"]
        v = nx @ p["wv"] + p["bv"]
        s = jnp.einsum("bqd,bkd->bqk", q, k) / (D ** 0.5)
        a = jax.nn.softmax(s, axis=-1)
        o = jnp.einsum("bqk,bkd->bqd", a, v)
        h = jax.nn.relu(o @ p["we1"] + p["be1"])
        h = jax.nn.relu(h @ p["we2"] + p["be2"])
        h = jax.nn.relu(h @ p["wd1"] + p["bd1"])
        h = jax.nn.sigmoid(h @ p["wd2"] + p["bd2"])
        return h @ p["wfc"] + p["bfc"]

    expected = ref(x, noise, params)

    # Default path: bf16 matmul operands (v6e/v7x-native MXU dtype), f32 accumulation.
    prep_bf16 = prepare_params(params, D, use_bf16=True)
    out_bf16 = feature_enhancer(x, noise, prep_bf16)
    jax.block_until_ready(out_bf16)
    assert out_bf16.shape == (B, S, D)
    assert bool(jnp.all(jnp.isfinite(out_bf16)))
    assert jnp.allclose(out_bf16, expected, atol=5e-2, rtol=5e-2)

    # Full-f32 path: only remaining numeric deviation is the approx EUP reciprocal.
    prep_f32 = prepare_params(params, D, use_bf16=False)
    out_f32 = feature_enhancer(x, noise, prep_f32)
    jax.block_until_ready(out_f32)
    assert jnp.allclose(out_f32, expected, atol=5e-3, rtol=5e-3)

    print("KERNEL_OK")
</pallas_src>

<mosaic_0001>
module attributes {stable_mosaic.version = 11 : i64} {
  func.func @_feature_enhancer_kernel(%arg0: i32, %arg1: memref<2x8x32xf32, #tpu.memory_space<vmem>>, %arg2: memref<2x8x32xf32, #tpu.memory_space<vmem>>, %arg3: memref<32x384xbf16, #tpu.memory_space<vmem>>, %arg4: memref<1x384xf32, #tpu.memory_space<vmem>>, %arg5: memref<128x128xbf16, #tpu.memory_space<vmem>>, %arg6: memref<1x128xf32, #tpu.memory_space<vmem>>, %arg7: memref<128x128xbf16, #tpu.memory_space<vmem>>, %arg8: memref<1x128xf32, #tpu.memory_space<vmem>>, %arg9: memref<128x128xbf16, #tpu.memory_space<vmem>>, %arg10: memref<1x128xf32, #tpu.memory_space<vmem>>, %arg11: memref<128x128xbf16, #tpu.memory_space<vmem>>, %arg12: memref<1x128xf32, #tpu.memory_space<vmem>>, %arg13: memref<128x32xbf16, #tpu.memory_space<vmem>>, %arg14: memref<1x32xf32, #tpu.memory_space<vmem>>, %arg15: memref<2x8x32xf32, #tpu.memory_space<vmem>>) attributes {dimension_semantics = [#tpu.dimension_semantics<parallel>], iteration_bounds = array<i64: 1>, scalar_prefetch = 0 : i64, scratch_operands = 0 : i64, tpu.core_type = #tpu.core_type<tc>, window_params = [{transform_indices = @transform_0, window_bounds = array<i64: 2, 8, 32>}, {transform_indices = @transform_1, window_bounds = array<i64: 2, 8, 32>}, {pipeline_mode = #tpu.pipeline_mode<synchronous>, transform_indices = @transform_2, window_bounds = array<i64: 32, 384>}, {pipeline_mode = #tpu.pipeline_mode<synchronous>, transform_indices = @transform_3, window_bounds = array<i64: 1, 384>}, {pipeline_mode = #tpu.pipeline_mode<synchronous>, transform_indices = @transform_4, window_bounds = array<i64: 128, 128>}, {pipeline_mode = #tpu.pipeline_mode<synchronous>, transform_indices = @transform_5, window_bounds = array<i64: 1, 128>}, {pipeline_mode = #tpu.pipeline_mode<synchronous>, transform_indices = @transform_6, window_bounds = array<i64: 128, 128>}, {pipeline_mode = #tpu.pipeline_mode<synchronous>, transform_indices = @transform_7, window_bounds = array<i64: 1, 128>}, {pipeline_mode = #tpu.pipeline_mode<synchronous>, transform_indices = @transform_8, window_bounds = array<i64: 128, 128>}, {pipeline_mode = #tpu.pipeline_mode<synchronous>, transform_indices = @transform_9, window_bounds = array<i64: 1, 128>}, {pipeline_mode = #tpu.pipeline_mode<synchronous>, transform_indices = @transform_10, window_bounds = array<i64: 128, 128>}, {pipeline_mode = #tpu.pipeline_mode<synchronous>, transform_indices = @transform_11, window_bounds = array<i64: 1, 128>}, {pipeline_mode = #tpu.pipeline_mode<synchronous>, transform_indices = @transform_12, window_bounds = array<i64: 128, 32>}, {pipeline_mode = #tpu.pipeline_mode<synchronous>, transform_indices = @transform_13, window_bounds = array<i64: 1, 32>}, {transform_indices = @transform_14, window_bounds = array<i64: 2, 8, 32>}]} {
    %c0 = arith.constant 0 : index
    %c0_0 = arith.constant 0 : index
    %c0_1 = arith.constant 0 : index
    %0 = vector.load %arg1[%c0, %c0_0, %c0_1] : memref<2x8x32xf32, #tpu.memory_space<vmem>>, vector<2x8x32xf32>
    %c0_2 = arith.constant 0 : index
    %c0_3 = arith.constant 0 : index
    %c0_4 = arith.constant 0 : index
    %1 = vector.load %arg2[%c0_2, %c0_3, %c0_4] : memref<2x8x32xf32, #tpu.memory_space<vmem>>, vector<2x8x32xf32>
    %2 = arith.addf %0, %1 : vector<2x8x32xf32>
    %3 = vector.shape_cast %2 : vector<2x8x32xf32> to vector<16x32xf32>
    %4 = arith.truncf %3 : vector<16x32xf32> to vector<16x32xbf16>
    %c0_5 = arith.constant 0 : index
    %c0_6 = arith.constant 0 : index
    %5 = vector.load %arg3[%c0_5, %c0_6] : memref<32x384xbf16, #tpu.memory_space<vmem>>, vector<32x384xbf16>
    %cst = arith.constant dense<0.000000e+00> : vector<16x384xf32>
    %6 = tpu.matmul %4, %5, %cst {dimension_numbers = #tpu.dot_dimension_numbers<[1], [0], [0], [1], [0, 0, 1, 1], [], []>} : vector<16x32xbf16>, vector<32x384xbf16>, vector<16x384xf32> -> vector<16x384xf32>
    %c0_7 = arith.constant 0 : index
    %c0_8 = arith.constant 0 : index
    %7 = vector.load %arg4[%c0_7, %c0_8] : memref<1x384xf32, #tpu.memory_space<vmem>>, vector<1x384xf32>
    %8 = vector.broadcast %7 : vector<1x384xf32> to vector<16x384xf32>
    %9 = arith.addf %6, %8 : vector<16x384xf32>
    %10 = vector.extract_strided_slice %9 {offsets = [0, 0], sizes = [16, 128], strides = [1, 1]} : vector<16x384xf32> to vector<16x128xf32>
    %11 = vector.shape_cast %10 : vector<16x128xf32> to vector<2x8x128xf32>
    %12 = vector.extract_strided_slice %9 {offsets = [0, 128], sizes = [16, 128], strides = [1, 1]} : vector<16x384xf32> to vector<16x128xf32>
    %13 = vector.shape_cast %12 : vector<16x128xf32> to vector<2x8x128xf32>
    %14 = vector.extract_strided_slice %9 {offsets = [0, 256], sizes = [16, 128], strides = [1, 1]} : vector<16x384xf32> to vector<16x128xf32>
    %15 = vector.shape_cast %14 : vector<16x128xf32> to vector<2x8x128xf32>
    %16 = arith.truncf %11 : vector<2x8x128xf32> to vector<2x8x128xbf16>
    %17 = arith.truncf %13 : vector<2x8x128xf32> to vector<2x8x128xbf16>
    "tpu.trace_start"() <{level = 10 : i32, message = "bqd,bkd->bqk"}> : () -> ()
    %cst_9 = arith.constant dense<0.000000e+00> : vector<2x8x8xf32>
    %18 = tpu.matmul %16, %17, %cst_9 {dimension_numbers = #tpu.dot_dimension_numbers<[2], [2], [1], [1], [0, 0, 0, 1, 1, 1], [0], [0]>} : vector<2x8x128xbf16>, vector<2x8x128xbf16>, vector<2x8x8xf32> -> vector<2x8x8xf32>
    "tpu.trace_stop"() : () -> ()
    %cst_10 = arith.constant dense<0xFF800000> : vector<2x8xf32>
    %19 = vector.multi_reduction <maximumf>, %18, %cst_10 [2] : vector<2x8x8xf32> to vector<2x8xf32>
    %20 = vector.shape_cast %19 : vector<2x8xf32> to vector<2x8x1xf32>
    %21 = vector.broadcast %20 : vector<2x8x1xf32> to vector<2x8x8xf32>
    %22 = arith.subf %18, %21 : vector<2x8x8xf32>
    %23 = math.exp %22 : vector<2x8x8xf32>
    %cst_11 = arith.constant dense<0.000000e+00> : vector<2x8xf32>
    %24 = vector.multi_reduction <add>, %23, %cst_11 [2] : vector<2x8x8xf32> to vector<2x8xf32>
    %25 = vector.shape_cast %24 : vector<2x8xf32> to vector<2x8x1xf32>
    %26 = tpu.reciprocal %25 {approx = true} : vector<2x8x1xf32> -> vector<2x8x1xf32>
    %27 = vector.broadcast %26 : vector<2x8x1xf32> to vector<2x8x8xf32>
    %28 = arith.mulf %23, %27 : vector<2x8x8xf32>
    %29 = arith.truncf %28 : vector<2x8x8xf32> to vector<2x8x8xbf16>
    %30 = arith.truncf %15 : vector<2x8x128xf32> to vector<2x8x128xbf16>
    "tpu.trace_start"() <{level = 10 : i32, message = "bqk,bkd->bqd"}> : () -> ()
    %cst_12 = arith.constant dense<0.000000e+00> : vector<2x8x128xf32>
    %31 = tpu.matmul %29, %30, %cst_12 {dimension_numbers = #tpu.dot_dimension_numbers<[2], [1], [1], [2], [0, 0, 0, 1, 1, 2], [0], [0]>} : vector<2x8x8xbf16>, vector<2x8x128xbf16>, vector<2x8x128xf32> -> vector<2x8x128xf32>
    "tpu.trace_stop"() : () -> ()
    %32 = vector.shape_cast %31 : vector<2x8x128xf32> to vector<16x128xf32>
    %33 = arith.truncf %32 : vector<16x128xf32> to vector<16x128xbf16>
    %c0_13 = arith.constant 0 : index
    %c0_14 = arith.constant 0 : index
    %34 = vector.load %arg5[%c0_13, %c0_14] : memref<128x128xbf16, #tpu.memory_space<vmem>>, vector<128x128xbf16>
    %cst_15 = arith.constant dense<0.000000e+00> : vector<16x128xf32>
    %35 = tpu.matmul %33, %34, %cst_15 {dimension_numbers = #tpu.dot_dimension_numbers<[1], [0], [0], [1], [0, 0, 1, 1], [], []>} : vector<16x128xbf16>, vector<128x128xbf16>, vector<16x128xf32> -> vector<16x128xf32>
    %c0_16 = arith.constant 0 : index
    %c0_17 = arith.constant 0 : index
    %36 = vector.load %arg6[%c0_16, %c0_17] : memref<1x128xf32, #tpu.memory_space<vmem>>, vector<1x128xf32>
    %37 = vector.broadcast %36 : vector<1x128xf32> to vector<16x128xf32>
    %38 = arith.addf %35, %37 : vector<16x128xf32>
    %cst_18 = arith.constant 0.000000e+00 : f32
    %39 = vector.broadcast %cst_18 : f32 to vector<16x128xf32>
    %40 = arith.maximumf %38, %39 : vector<16x128xf32>
    %41 = arith.truncf %40 : vector<16x128xf32> to vector<16x128xbf16>
    %c0_19 = arith.constant 0 : index
    %c0_20 = arith.constant 0 : index
    %42 = vector.load %arg7[%c0_19, %c0_20] : memref<128x128xbf16, #tpu.memory_space<vmem>>, vector<128x128xbf16>
    %cst_21 = arith.constant dense<0.000000e+00> : vector<16x128xf32>
    %43 = tpu.matmul %41, %42, %cst_21 {dimension_numbers = #tpu.dot_dimension_numbers<[1], [0], [0], [1], [0, 0, 1, 1], [], []>} : vector<16x128xbf16>, vector<128x128xbf16>, vector<16x128xf32> -> vector<16x128xf32>
    %c0_22 = arith.constant 0 : index
    %c0_23 = arith.constant 0 : index
    %44 = vector.load %arg8[%c0_22, %c0_23] : memref<1x128xf32, #tpu.memory_space<vmem>>, vector<1x128xf32>
    %45 = vector.broadcast %44 : vector<1x128xf32> to vector<16x128xf32>
    %46 = arith.addf %43, %45 : vector<16x128xf32>
    %cst_24 = arith.constant 0.000000e+00 : f32
    %47 = vector.broadcast %cst_24 : f32 to vector<16x128xf32>
    %48 = arith.maximumf %46, %47 : vector<16x128xf32>
    %49 = arith.truncf %48 : vector<16x128xf32> to vector<16x128xbf16>
    %c0_25 = arith.constant 0 : index
    %c0_26 = arith.constant 0 : index
    %50 = vector.load %arg9[%c0_25, %c0_26] : memref<128x128xbf16, #tpu.memory_space<vmem>>, vector<128x128xbf16>
    %cst_27 = arith.constant dense<0.000000e+00> : vector<16x128xf32>
    %51 = tpu.matmul %49, %50, %cst_27 {dimension_numbers = #tpu.dot_dimension_numbers<[1], [0], [0], [1], [0, 0, 1, 1], [], []>} : vector<16x128xbf16>, vector<128x128xbf16>, vector<16x128xf32> -> vector<16x128xf32>
    %c0_28 = arith.constant 0 : index
    %c0_29 = arith.constant 0 : index
    %52 = vector.load %arg10[%c0_28, %c0_29] : memref<1x128xf32, #tpu.memory_space<vmem>>, vector<1x128xf32>
    %53 = vector.broadcast %52 : vector<1x128xf32> to vector<16x128xf32>
    %54 = arith.addf %51, %53 : vector<16x128xf32>
    %cst_30 = arith.constant 0.000000e+00 : f32
    %55 = vector.broadcast %cst_30 : f32 to vector<16x128xf32>
    %56 = arith.maximumf %54, %55 : vector<16x128xf32>
    %57 = arith.truncf %56 : vector<16x128xf32> to vector<16x128xbf16>
    %c0_31 = arith.constant 0 : index
    %c0_32 = arith.constant 0 : index
    %58 = vector.load %arg11[%c0_31, %c0_32] : memref<128x128xbf16, #tpu.memory_space<vmem>>, vector<128x128xbf16>
    %cst_33 = arith.constant dense<0.000000e+00> : vector<16x128xf32>
    %59 = tpu.matmul %57, %58, %cst_33 {dimension_numbers = #tpu.dot_dimension_numbers<[1], [0], [0], [1], [0, 0, 1, 1], [], []>} : vector<16x128xbf16>, vector<128x128xbf16>, vector<16x128xf32> -> vector<16x128xf32>
    %c0_34 = arith.constant 0 : index
    %c0_35 = arith.constant 0 : index
    %60 = vector.load %arg12[%c0_34, %c0_35] : memref<1x128xf32, #tpu.memory_space<vmem>>, vector<1x128xf32>
    %61 = vector.broadcast %60 : vector<1x128xf32> to vector<16x128xf32>
    %62 = arith.addf %59, %61 : vector<16x128xf32>
    %63 = arith.negf %62 : vector<16x128xf32>
    %64 = math.exp %63 : vector<16x128xf32>
    %cst_36 = arith.constant 1.000000e+00 : f32
    %65 = vector.broadcast %cst_36 : f32 to vector<16x128xf32>
    %66 = arith.addf %65, %64 : vector<16x128xf32>
    %67 = arith.divf %65, %66 : vector<16x128xf32>
    %68 = arith.truncf %67 : vector<16x128xf32> to vector<16x128xbf16>
    %c0_37 = arith.constant 0 : index
    %c0_38 = arith.constant 0 : index
    %69 = vector.load %arg13[%c0_37, %c0_38] : memref<128x32xbf16, #tpu.memory_space<vmem>>, vector<128x32xbf16>
    %cst_39 = arith.constant dense<0.000000e+00> : vector<16x32xf32>
    %70 = tpu.matmul %68, %69, %cst_39 {dimension_numbers = #tpu.dot_dimension_numbers<[1], [0], [0], [1], [0, 0, 1, 1], [], []>} : vector<16x128xbf16>, vector<128x32xbf16>, vector<16x32xf32> -> vector<16x32xf32>
    %c0_40 = arith.constant 0 : index
    %c0_41 = arith.constant 0 : index
    %71 = vector.load %arg14[%c0_40, %c0_41] : memref<1x32xf32, #tpu.memory_space<vmem>>, vector<1x32xf32>
    %72 = vector.broadcast %71 : vector<1x32xf32> to vector<16x32xf32>
    %73 = arith.addf %70, %72 : vector<16x32xf32>
    %74 = vector.shape_cast %73 : vector<16x32xf32> to vector<2x8x32xf32>
    %c0_42 = arith.constant 0 : index
    %c0_43 = arith.constant 0 : index
    %c0_44 = arith.constant 0 : index
    %75 = vector.load %arg15[%c0_42, %c0_43, %c0_44] : memref<2x8x32xf32, #tpu.memory_space<vmem>>, vector<2x8x32xf32>
    tpu.vector_store %arg15[%c0_42, %c0_43, %c0_44], %74 {strides = array<i32>} : memref<2x8x32xf32, #tpu.memory_space<vmem>>, vector<2x8x32xf32>,
    return
  }
  func.func @transform_0(%arg0: i32) -> (i32, i32, i32) {
    %c0_i32 = arith.constant 0 : i32
    %c0_i32_0 = arith.constant 0 : i32
    %c0_i32_1 = arith.constant 0 : i32
    return %arg0, %c0_i32, %c0_i32_0 : i32, i32, i32
  }
  func.func @transform_1(%arg0: i32) -> (i32, i32, i32) {
    %c0_i32 = arith.constant 0 : i32
    %c0_i32_0 = arith.constant 0 : i32
    %c0_i32_1 = arith.constant 0 : i32
    return %arg0, %c0_i32, %c0_i32_0 : i32, i32, i32
  }
  func.func @transform_2(%arg0: i32) -> (i32, i32) {
    %c0_i32 = arith.constant 0 : i32
    %c0_i32_0 = arith.constant 0 : i32
    %c0_i32_1 = arith.constant 0 : i32
    return %c0_i32, %c0_i32_0 : i32, i32
  }
  func.func @transform_3(%arg0: i32) -> (i32, i32) {
    %c0_i32 = arith.constant 0 : i32
    %c0_i32_0 = arith.constant 0 : i32
    %c0_i32_1 = arith.constant 0 : i32
    return %c0_i32, %c0_i32_0 : i32, i32
  }
  func.func @transform_4(%arg0: i32) -> (i32, i32) {
    %c0_i32 = arith.constant 0 : i32
    %c0_i32_0 = arith.constant 0 : i32
    %c0_i32_1 = arith.constant 0 : i32
    return %c0_i32, %c0_i32_0 : i32, i32
  }
  func.func @transform_5(%arg0: i32) -> (i32, i32) {
    %c0_i32 = arith.constant 0 : i32
    %c0_i32_0 = arith.constant 0 : i32
    %c0_i32_1 = arith.constant 0 : i32
    return %c0_i32, %c0_i32_0 : i32, i32
  }
  func.func @transform_6(%arg0: i32) -> (i32, i32) {
    %c0_i32 = arith.constant 0 : i32
    %c0_i32_0 = arith.constant 0 : i32
    %c0_i32_1 = arith.constant 0 : i32
    return %c0_i32, %c0_i32_0 : i32, i32
  }
  func.func @transform_7(%arg0: i32) -> (i32, i32) {
    %c0_i32 = arith.constant 0 : i32
    %c0_i32_0 = arith.constant 0 : i32
    %c0_i32_1 = arith.constant 0 : i32
    return %c0_i32, %c0_i32_0 : i32, i32
  }
  func.func @transform_8(%arg0: i32) -> (i32, i32) {
    %c0_i32 = arith.constant 0 : i32
    %c0_i32_0 = arith.constant 0 : i32
    %c0_i32_1 = arith.constant 0 : i32
    return %c0_i32, %c0_i32_0 : i32, i32
  }
  func.func @transform_9(%arg0: i32) -> (i32, i32) {
    %c0_i32 = arith.constant 0 : i32
    %c0_i32_0 = arith.constant 0 : i32
    %c0_i32_1 = arith.constant 0 : i32
    return %c0_i32, %c0_i32_0 : i32, i32
  }
  func.func @transform_10(%arg0: i32) -> (i32, i32) {
    %c0_i32 = arith.constant 0 : i32
    %c0_i32_0 = arith.constant 0 : i32
    %c0_i32_1 = arith.constant 0 : i32
    return %c0_i32, %c0_i32_0 : i32, i32
  }
  func.func @transform_11(%arg0: i32) -> (i32, i32) {
    %c0_i32 = arith.constant 0 : i32
    %c0_i32_0 = arith.constant 0 : i32
    %c0_i32_1 = arith.constant 0 : i32
    return %c0_i32, %c0_i32_0 : i32, i32
  }
  func.func @transform_12(%arg0: i32) -> (i32, i32) {
    %c0_i32 = arith.constant 0 : i32
    %c0_i32_0 = arith.constant 0 : i32
    %c0_i32_1 = arith.constant 0 : i32
    return %c0_i32, %c0_i32_0 : i32, i32
  }
  func.func @transform_13(%arg0: i32) -> (i32, i32) {
    %c0_i32 = arith.constant 0 : i32
    %c0_i32_0 = arith.constant 0 : i32
    %c0_i32_1 = arith.constant 0 : i32
    return %c0_i32, %c0_i32_0 : i32, i32
  }
  func.func @transform_14(%arg0: i32) -> (i32, i32, i32) {
    %c0_i32 = arith.constant 0 : i32
    %c0_i32_0 = arith.constant 0 : i32
    %c0_i32_1 = arith.constant 0 : i32
    return %arg0, %c0_i32, %c0_i32_0 : i32, i32, i32
  }
}

</mosaic_0001>

<bundles_post_ra>
// kernel: tpu_custom_call.1
= control target key start
LH: loop header
LB: loop body
LE: loop exit
PB: predicated region body
PF: predicated region fallthrough
CT: control target
= control target key end

     0   :  { %19 = vsyncpa [#allocation3], 0  ;;  %s1422_s0 = inlined_call_operand.vmem [shape: f32[2,8,32], index: 0, kind: input, shape index: {}]   ;;  %s1423_s1 = inlined_call_operand.hbm [shape: f32[2,8,32], index: 1, kind: input, shape index: {}]   ;;  %s1424_s2 = inlined_call_operand.hbm [shape: bf16[32,384], index: 2, kind: input, shape index: {}]   ;;  %s1425_s3 = inlined_call_operand.vmem [shape: f32[1,384], index: 3, kind: input, shape index: {}]   ;;  %s1426_s4 = inlined_call_operand.vmem [shape: bf16[128,128], index: 4, kind: input, shape index: {}]   ;;  %s1427_s5 = inlined_call_operand.vmem [shape: f32[1,128], index: 5, kind: input, shape index: {}]   ;;  %s1428_s6 = inlined_call_operand.hbm [shape: bf16[128,128], index: 6, kind: input, shape index: {}]   ;;  %s1429_s7 = inlined_call_operand.vmem [shape: f32[1,128], index: 7, kind: input, shape index: {}]   ;;  %s1430_s8 = inlined_call_operand.hbm [shape: bf16[128,128], index: 8, kind: input, shape index: {}]   ;;  %s1431_s9 = inlined_call_operand.vmem [shape: f32[1,128], index: 9, kind: input, shape index: {}]   ;;  %s1432_s10 = inlined_call_operand.hbm [shape: bf16[128,128], index: 10, kind: input, shape index: {}]   ;;  %s1433_s11 = inlined_call_operand.vmem [shape: f32[1,128], index: 11, kind: input, shape index: {}]   ;;  %s1434_s12 = inlined_call_operand.vmem [shape: bf16[128,32], index: 12, kind: input, shape index: {}]   ;;  %s1435_s13 = inlined_call_operand.vmem [shape: f32[1,32], index: 13, kind: input, shape index: {}]   ;;  %s1436_s14 = inlined_call_operand.hbm [shape: f32[2,8,32], index: 14, kind: output, shape index: {}]  }
   0x1   :  { %20 = vsyncpa [#allocation6], 0 }
   0x2   :  { %21 = vsyncpa [#allocation9], 0  ;;  %s42_s15 = sshll.u32 %s1424_s2, 4  ;;  %s43_s15 = int_to_ptr.hbm [resolvable:$true] %s42_s15 }
   0x3   :  { %22 = vsyncpa [#allocation4], 0  ;;  %s1228_s16 = smov [#allocation5]   ;;  %s1229_s18 = smov 192  }
   0x4   :  { %s44_s17 = sshll.u32 %s1228_s16, 4  ;;  %s1230_s19 = smov 12   ;;  %s45_s17 = int_to_ptr.vmem [resolvable:$true] %s44_s17 }
   0x5   :  { %50 = dma.hbm_to_vmem [thread:$0]  %s43_s15, 768, %s45_s17, [#allocation6], %s1229_s18, %s1229_s18, %s1230_s19  }
   0x6   :  { %s76_s22 = sshll.u32 %s1430_s8, 4  ;;  %s1231_s23 = smov [#allocation8]   ;;  %s77_s22 = int_to_ptr.hbm [resolvable:$true] %s76_s22 }
   0x7   :  { %s78_s24 = sshll.u32 %s1231_s23, 4  ;;  %s29_s27 = sshll.u32 %s1423_s1, 4  ;;  %s79_s24 = int_to_ptr.vmem [resolvable:$true] %s78_s24  ;;  %s30_s27 = int_to_ptr.hbm [resolvable:$true] %s29_s27 }
   0x8   :  { %s1232_s2 = smov 64   ;;  %s1233_s28 = smov 4  }
   0x9   :  { %84 = dma.hbm_to_vmem [thread:$0]  %s77_s22, 1024, %s79_s24, [#allocation9], %s1232_s2, %s1232_s2, %s1233_s28  }
   0xa   :  { %s1234_s29 = smov [#allocation2]   ;;  %s61_s17 = sshll.u32 %s1428_s6, 4  ;;  %s62_s17 = int_to_ptr.hbm [resolvable:$true] %s61_s17 }
   0xb   :  { %s31_s30 = sshll.u32 %s1234_s29, 4  ;;  %s1235_s8 = smov 128   ;;  %s32_s30 = int_to_ptr.vmem [resolvable:$true] %s31_s30 }
   0xc   :  { %s1236_s18 = smov 8   ;;  %s1237_s1 = smov [#allocation7]  }
   0xd   :  { %37 = dma.hbm_to_vmem [thread:$0]  %s30_s27, 256, %s32_s30, [#allocation3], %s1235_s8, %s1235_s8, %s1236_s18  }
   0xe   :  { %s63_s19 = sshll.u32 %s1237_s1, 4  ;;  %s91_s22 = sshll.u32 %s1432_s10, 4  ;;  %s64_s19 = int_to_ptr.vmem [resolvable:$true] %s63_s19  ;;  %s92_s22 = int_to_ptr.hbm [resolvable:$true] %s91_s22 }
   0xf   :  { %69 = dma.hbm_to_vmem [thread:$0]  %s62_s17, 1024, %s64_s19, [#allocation6], %s1232_s2, %s1232_s2, %s1233_s28  }
  0x10   :  { %s1238_s23 = smov [#allocation10]  }
  0x11   :  { %s93_s24 = sshll.u32 %s1238_s23, 4  ;;  %s94_s24 = int_to_ptr.vmem [resolvable:$true] %s93_s24 }
  0x12   :  { %99 = dma.hbm_to_vmem [thread:$0]  %s92_s22, 1024, %s94_s24, [#allocation9], %s1232_s2, %s1232_s2, %s1233_s28  }
  0x13   :  { %1220 = dma.done.wait [#allocation3], 256  }
  0x14   :  { %1221 = vsyncadd [#allocation3], 4294967040 }
  0x15   :  { %1222 = dma.done.wait [#allocation6], 1792  }
  0x16   :  { %1223 = vsyncadd [#allocation6], 4294965504 }
  0x17   :  { %1224 = dma.done.wait [#allocation9], 2048  }
  0x18   :  { %1225 = vsyncadd [#allocation9], 4294965248  ;;  %v1000_v0 = vld [vmem:[#allocation5 + $0x1c] sm:$0xf]  ;;  %v822_v1 = vld [vmem:[#allocation5 + $0x24] sm:$0xf0] }
  0x19   :  { %v997_v2 = vld [vmem:[#allocation5 + $0x4] sm:$0xf]  ;;  %v825_v3 = vor.u32 %v1000_v0, %v822_v1  ;;  %v810_v4 = vld [vmem:[#allocation5 + $0xc] sm:$0xf0]  ;;  %v820_v5 = vld [vmem:[#allocation5 + $0x18] sm:$0xf] }
  0x1a   :  { %v1001_v6 = vld [vmem:[#allocation5 + $0x20] sm:$0xf0]  ;;  %v127_v8 = vld [vmem:[%s1422_s0] sm:$0xff]  ;;  %v128_v9 = vld [vmem:[%s1422_s0 + $0x8] sm:$0xff]  ;;  %v813_v11 = vor.u32 %v997_v2, %v810_v4  ;;  %vm182_vm0 = vcmask 261120   ;;  %vm258_vm1 = vcmask 64512  }
  0x1b   :  { %v821_v7 = vor.u32 %v1001_v6, %v820_v5  ;;  %v129_v10 = vld [vmem:[#allocation2] sm:$0xff]  ;;  %206 = vmatpush.bf16.msra.mxu1 %v825_v3  ;;  %v130_v12 = vld [vmem:[#allocation2 + $0x8] sm:$0xff]  ;;  %v808_v14 = vld [vmem:[#allocation5] sm:$0xf]  ;;  %vm288_vm2 = vcmask 1043456   ;;  %s1239_s6 = smov [#allocation11]  }
  0x1c   :  { %v131_v13 = vadd.f32 %v129_v10, %v127_v8  ;;  %v998_v15 = vld [vmem:[#allocation5 + $0x8] sm:$0xf0]  ;;  %v132_v16 = vadd.f32 %v130_v12, %v128_v9  ;;  %v142_v19 = vld [vmem:[%s1425_s3] sm:$0x7]  ;;  %v828_v34 = vld [vmem:[#allocation5 + $0x20] sm:$0xf] }
  0x1d   :  { %192 = vmatpush.bf16.msra.mxu0 %v821_v7  ;;  %v809_v17 = vor.u32 %v998_v15, %v808_v14  ;;  %v145_v20 = vperm.slane %v142_v19, 1  ;;  %v144_v22 = vperm.slane %v142_v19, 0  ;;  %v1002_v35 = vld [vmem:[#allocation5 + $0x28] sm:$0xf0]  ;;  %v816_v36 = vld [vmem:[#allocation5 + $0x8] sm:$0xf] }
  0x1e   :  { %v133_v18 = vpack.c.bf16 %v132_v16, %v131_v13  ;;  %v829_v37 = vor.u32 %v1002_v35, %v828_v34  ;;  %v999_v38 = vld [vmem:[#allocation5 + $0x10] sm:$0xf0]  ;;  %v146_v46 = vperm.slane %v142_v19, 2  ;;  %v1010_v1 = vld [vmem:[%s1426_s4 + $0x38] sm:$0xff]  ;;  %v1009_v2 = vld [vmem:[%s1426_s4 + $0x30] sm:$0xff]  ;;  %s791_s25 = sshll.u32 %s1436_s14, 4  ;;  %s792_s25 = int_to_ptr.hbm [resolvable:$true] %s791_s25 }
  0x1f   :  { %207 = vmatpush.bf16.msra.mxu1 %v813_v11  ;;  %v817_v39 = vor.u32 %v999_v38, %v816_v36  ;;  %v1008_v3 = vld [vmem:[%s1426_s4 + $0x28] sm:$0xff]  ;;  %v1007_v4 = vld [vmem:[%s1426_s4 + $0x20] sm:$0xff]  ;;  %v1006_v6 = vld [vmem:[%s1426_s4 + $0x18] sm:$0xff] }
  0x20   :  { %220 = vmatpush.bf16.msra.mxu2 %v829_v37  ;;  %v1005_v7 = vld [vmem:[%s1426_s4 + $0x10] sm:$0xff]  ;;  %v1004_v12 = vld [vmem:[%s1426_s4 + $0x8] sm:$0xff]  ;;  %v1003_v16 = vld [vmem:[%s1426_s4] sm:$0xff]  ;;  %s789_s4 = sshll.u32 %s1239_s6, 4  ;;  %s790_s4 = int_to_ptr.vmem [resolvable:$true] %s789_s4 }
  0x21   :  { %193 = vmatpush.bf16.msra.mxu0 %v809_v17  ;;  %v1018_v17 = vld [vmem:[#allocation7 + $0x38] sm:$0xff]  ;;  %v1016_v19 = vld [vmem:[#allocation7 + $0x28] sm:$0xff]  ;;  %v1055_v35 = vld [vmem:[%s1427_s5] ss:$0 sm:$0xff] }
  0x22   :  { %831 = vmatmul.msk.bf16.vlgmr.msra.gmra.mxu1 %vm182_vm0, %v133_v18 }
  0x24   :  { %830 = vmatmul.msk.bf16.vlgmr.msra.gmra.mxu0 %vm182_vm0, %v133_v18  ;;  %221 = vmatpush.bf16.msra.mxu2 %v817_v39 }
  0x27   :  { %832 = vmatmul.msk.bf16.vlgmr.msra.gmra.mxu2 %vm182_vm0, %v133_v18  ;;  %v1017_v18 = vld [vmem:[#allocation7 + $0x30] sm:$0xff] }
  0x9f   :  { %v209_v21 = vpop.f32.mrf.mxu1 }
  0xa0   :  { %v210_v23 = vadd.f32 %v209_v21, %v145_v20 }
  0xa1   :  { %v195_v24 = vpop.f32.mrf.mxu0 }
  0xa2   :  { %v230_v25 = vpack.c.bf16 %v210_v23, %v210_v23  ;;  %v196_v26 = vadd.f32 %v195_v24, %v144_v22 }
  0xa4   :  { %239 = vmatpush.bf16.xpose.msra.mxu3 %v230_v25  ;;  %v228_v27 = vpack.c.bf16 %v196_v26, %v196_v26  ;;  %v1014_v26 = vld [vmem:[#allocation7 + $0x18] sm:$0xff] }
  0xa7   :  { %v211_v28 = vpop.f32.mrf.mxu1 }
  0xa8   :  { %v212_v29 = vadd.f32 %v211_v28, %v145_v20  ;;  %v1015_v20 = vld [vmem:[#allocation7 + $0x20] sm:$0xff]  ;;  %v1012_v28 = vld [vmem:[#allocation7 + $0x8] sm:$0xff] }
  0xa9   :  { %v197_v31 = vpop.f32.mrf.mxu0 }
  0xaa   :  { %v231_v30 = vpack.c.bf16 %v212_v29, %v212_v29  ;;  %v198_v32 = vadd.f32 %v197_v31, %v144_v22  ;;  %v223_v49 = vpop.f32.mrf.mxu2  ;;  %v1011_v29 = vld [vmem:[#allocation7] sm:$0xff]  ;;  %v1025_v31 = vld [vmem:[#allocation8 + $0x30] sm:$0xff] }
  0xab   :  { %240 = vmatmul.bf16.vlgmr.msra.gmra.mxu3 %v228_v27  ;;  %v224_v51 = vadd.f32 %v223_v49, %v146_v46  ;;  %v1013_v27 = vld [vmem:[#allocation7 + $0x10] sm:$0xff]  ;;  %v1031_v49 = vld [vmem:[#allocation10 + $0x20] sm:$0xff] }
  0xac   :  { %252 = vmatpush.bf16.xpose.msrb.mxu0 %v231_v30  ;;  %v229_v33 = vpack.c.bf16 %v198_v32, %v198_v32  ;;  %393 = vmatpush.bf16.msrb.mxu3 %v1010_v1  ;;  %v1026_v30 = vld [vmem:[#allocation8 + $0x38] sm:$0xff]  ;;  %v1024_v32 = vld [vmem:[#allocation8 + $0x28] sm:$0xff] }
  0xad   :  { %v283_v52 = vpack.c.bf16 %v224_v51, %v224_v51  ;;  %v1056_v51 = vld [vmem:[%s1429_s7] ss:$0 sm:$0xff] }
  0xaf   :  { %v290_v53 = vsel %vm288_vm2, %v283_v52, 0 }
  0xb0   :  { %299 = vmatpush.bf16.msrb.mxu1 %v290_v53  ;;  %394 = vmatpush.bf16.msrb.mxu3 %v1009_v2 }
  0xb2   :  { %v225_v56 = vpop.f32.mrf.mxu2 }
  0xb3   :  { %253 = vmatmul.bf16.vlgmr.msrb.gmra.mxu0 %v229_v33  ;;  %v226_v59 = vadd.f32 %v225_v56, %v146_v46  ;;  %v1023_v33 = vld [vmem:[#allocation8 + $0x20] sm:$0xff]  ;;  %v1034_v46 = vld [vmem:[#allocation10 + $0x38] sm:$0xff] }
  0xb4   :  { %395 = vmatpush.bf16.msrb.mxu3 %v1008_v3  ;;  %478 = vmatpush.bf16.msra.mxu0 %v1018_v17  ;;  %v1035_v17 = vld [vmem:[%s1434_s12] sm:$0xff] }
  0xb5   :  { %v284_v61 = vpack.c.bf16 %v226_v59, %v226_v59  ;;  %563 = vmatpush.bf16.msra.mxu1 %v1026_v30  ;;  %v1029_v59 = vld [vmem:[#allocation10 + $0x10] sm:$0xff] }
  0xb7   :  { %v309_v62 = vsel %vm288_vm2, %v284_v61, 0  ;;  %v1027_v61 = vld [vmem:[#allocation10] sm:$0xff] }
  0xb8   :  { %318 = vmatpush.bf16.msrb.mxu2 %v309_v62  ;;  %396 = vmatpush.bf16.msrb.mxu3 %v1007_v4 }
  0xb9   :  { %479 = vmatpush.bf16.msra.mxu0 %v1017_v18  ;;  %564 = vmatpush.bf16.msra.mxu1 %v1025_v31 }
  0xbc   :  { %397 = vmatpush.bf16.msrb.mxu3 %v1006_v6  ;;  %648 = vmatpush.bf16.msra.mxu2 %v1034_v46  ;;  %v1042_v6 = vld [vmem:[%s1434_s12 + $0x38] sm:$0xff]  ;;  %v1059_v46 = vld [vmem:[%s1435_s13] ss:$0 sm:$0xff] }
  0xbd   :  { %480 = vmatpush.bf16.msra.mxu0 %v1016_v19  ;;  %565 = vmatpush.bf16.msra.mxu1 %v1024_v32 }
  0xc0   :  { %398 = vmatpush.bf16.msrb.mxu3 %v1005_v7  ;;  %v1041_v7 = vld [vmem:[%s1434_s12 + $0x30] sm:$0xff] }
  0xc1   :  { %481 = vmatpush.bf16.msra.mxu0 %v1015_v20  ;;  %566 = vmatpush.bf16.msra.mxu1 %v1023_v33 }
  0xc4   :  { %399 = vmatpush.bf16.msrb.mxu3 %v1004_v12  ;;  %v1037_v12 = vld [vmem:[%s1434_s12 + $0x10] sm:$0xff] }
  0xc5   :  { %482 = vmatpush.bf16.msra.mxu0 %v1014_v26 }
  0xc8   :  { %400 = vmatpush.bf16.msrb.mxu3 %v1003_v16 }
  0xc9   :  { %483 = vmatpush.bf16.msra.mxu0 %v1013_v27 }
  0xcc   :  { %769 = vmatpush.bf16.msra.mxu3 %v1042_v6 }
  0xcd   :  { %484 = vmatpush.bf16.msra.mxu0 %v1012_v28 }
  0xd0   :  { %770 = vmatpush.bf16.msra.mxu3 %v1041_v7 }
  0xd1   :  { %485 = vmatpush.bf16.msra.mxu0 %v1011_v29 }
 0x12e   :  { %v241_v40 = vpop.f32.mrf.mxu3 }
 0x12f   :  { %v259_v45 = vsel %vm258_vm1, %v241_v40, -inf }
 0x130   :  { %v254_v41 = vpop.f32.mrf.mxu0 }
 0x131   :  { %v262_v42 = vsel %vm258_vm1, %v254_v41, -inf }
 0x132   :  { %263 = vmax.xlane.f32.xlu0 %v262_v42  ;;  %v1022_v42 = vld [vmem:[#allocation8 + $0x18] sm:$0xff] }
 0x133   :  { %567 = vmatpush.bf16.msra.mxu1 %v1022_v42 }
 0x136   :  { %v243_v43 = vpop.f32.mrf.mxu3 }
 0x137   :  { %v1021_v43 = vld [vmem:[#allocation8 + $0x10] sm:$0xff] }
 0x138   :  { %v256_v44 = vpop.f32.mrf.mxu0  ;;  %568 = vmatpush.bf16.msra.mxu1 %v1021_v43 }
 0x139   :  { %v1020_v44 = vld [vmem:[#allocation8 + $0x8] sm:$0xff] }
 0x13a   :  { %260 = vmax.xlane.f32.xlu0 %v259_v45  ;;  %v1019_v45 = vld [vmem:[#allocation8] sm:$0xff] }
 0x13c   :  { %569 = vmatpush.bf16.msra.mxu1 %v1020_v44 }
 0x140   :  { %570 = vmatpush.bf16.msra.mxu1 %v1019_v45 }
 0x1a5   :  { %v264_v47 = vpop.xlane.xlu0 %263 }
 0x1a6   :  { %v266_v48 = vsub.f32 %v254_v41, %v264_v47  ;;  %v1033_v47 = vld [vmem:[#allocation10 + $0x30] sm:$0xff] }
 0x1a7   :  { %649 = vmatpush.bf16.msra.mxu2 %v1033_v47 }
 0x1a8   :  { %v269_v50 = vmul.f32 1.442695, %v266_v48  ;;  %v1032_v48 = vld [vmem:[#allocation10 + $0x28] sm:$0xff] }
 0x1aa   :  { %1060 = vpow2.f32 %v269_v50 }
 0x1ab   :  { %650 = vmatpush.bf16.msra.mxu2 %v1032_v48 }
 0x1ad   :  { %v261_v54 = vpop.xlane.xlu0 %260 }
 0x1ae   :  { %v265_v55 = vsub.f32 %v241_v40, %v261_v54 }
 0x1af   :  { %651 = vmatpush.bf16.msra.mxu2 %v1031_v49 }
 0x1b0   :  { %v1061_v57 = vpop.eup %1060  ;;  %v267_v58 = vmul.f32 1.442695, %v265_v55 }
 0x1b1   :  { %v274_v60 = vsel %vm258_vm1, %v1061_v57, 0.0 }
 0x1b2   :  { %1062 = vpow2.f32 %v267_v58  ;;  %275 = vadd.xlane.f32.xlu1 %v274_v60  ;;  %v1030_v58 = vld [vmem:[#allocation10 + $0x18] sm:$0xff]  ;;  %v1028_v60 = vld [vmem:[#allocation10 + $0x8] sm:$0xff] }
 0x1b3   :  { %652 = vmatpush.bf16.msra.mxu2 %v1030_v58 }
 0x1b7   :  { %653 = vmatpush.bf16.msra.mxu2 %v1029_v59 }
 0x1b8   :  { %v1063_v63 = vpop.eup %1062 }
 0x1b9   :  { %v271_v0 = vsel %vm258_vm1, %v1063_v63, 0.0 }
 0x1ba   :  { %272 = vadd.xlane.f32.xlu1 %v271_v0 }
 0x1bb   :  { %654 = vmatpush.bf16.msra.mxu2 %v1028_v60 }
 0x1bf   :  { %655 = vmatpush.bf16.msra.mxu2 %v1027_v61 }
 0x225   :  { %v276_v5 = vpop.xlane.xlu1 %275 }
 0x226   :  { %1064 = vrcp.f32 %v276_v5 }
 0x22c   :  { %v1065_v8 = vpop.eup %1064 }
 0x22d   :  { %v280_v9 = vmul.f32 %v1065_v8, %v1061_v57  ;;  %v273_v10 = vpop.xlane.xlu1 %272  ;;  %v1040_v8 = vld [vmem:[%s1434_s12 + $0x28] sm:$0xff] }
 0x22e   :  { %1066 = vrcp.f32 %v273_v10  ;;  %771 = vmatpush.bf16.msra.mxu3 %v1040_v8  ;;  %v1038_v10 = vld [vmem:[%s1434_s12 + $0x18] sm:$0xff] }
 0x22f   :  { %v282_v11 = vpack.c.bf16 %v280_v9, %v280_v9  ;;  %v1039_v9 = vld [vmem:[%s1434_s12 + $0x20] sm:$0xff] }
 0x231   :  { %834 = vmatmul.msk.bf16.vlgmr.msrb.gmra.mxu2 %vm258_vm1, %v282_v11  ;;  %v1058_v11 = vld [vmem:[%s1433_s11] ss:$0 sm:$0xff] }
 0x232   :  { %772 = vmatpush.bf16.msra.mxu3 %v1039_v9 }
 0x234   :  { %v1067_v13 = vpop.eup %1066 }
 0x235   :  { %v279_v14 = vmul.f32 %v1067_v13, %v1063_v63  ;;  %v1057_v63 = vld [vmem:[%s1431_s9] ss:$0 sm:$0xff]  ;;  %v1036_v13 = vld [vmem:[%s1434_s12 + $0x8] sm:$0xff] }
 0x236   :  { %773 = vmatpush.bf16.msra.mxu3 %v1038_v10 }
 0x237   :  { %v281_v15 = vpack.c.bf16 %v279_v14, %v279_v14 }
 0x239   :  { %833 = vmatmul.msk.bf16.vlgmr.msrb.gmra.mxu1 %vm258_vm1, %v281_v15 }
 0x23a   :  { %774 = vmatpush.bf16.msra.mxu3 %v1037_v12 }
 0x23e   :  { %775 = vmatpush.bf16.msra.mxu3 %v1036_v13 }
 0x242   :  { %776 = vmatpush.bf16.msra.mxu3 %v1035_v17 }
 0x2b4   :  { %v320_v21 = vpop.f32.mrf.mxu2 }
 0x2b6   :  { %v301_v22 = vpop.f32.mrf.mxu1 }
 0x2b7   :  { %v324_v23 = vpack.c.bf16 %v320_v21, %v301_v22 }
 0x2b9   :  { %401 = vmatmul.bf16.vlgmr.msrb.gmra.mxu3 %v324_v23 }
 0x2bc   :  { %v322_v24 = vpop.f32.mrf.mxu2 }
 0x2be   :  { %v303_v25 = vpop.f32.mrf.mxu1 }
 0x33c   :  { %v402_v34 = vpop.f32.mrf.mxu3 }
 0x33d   :  { %v403_v36 = vadd.f32 %v1055_v35, %v402_v34 }
 0x33f   :  { %v407_v39 = vmax.f32 %v403_v36, 0.0 }
 0x344   :  { %v404_v37 = vpop.f32.mrf.mxu3 }
 0x345   :  { %v405_v38 = vadd.f32 %v1055_v35, %v404_v37 }
 0x347   :  { %v408_v40 = vmax.f32 %v405_v38, 0.0 }
 0x349   :  { %v409_v41 = vpack.c.bf16 %v408_v40, %v407_v39 }
 0x34b   :  { %486 = vmatmul.bf16.vlgmr.msra.gmra.mxu0 %v409_v41 }
 0x3c8   :  { %v487_v50 = vpop.f32.mrf.mxu0 }
 0x3c9   :  { %v488_v52 = vadd.f32 %v1056_v51, %v487_v50 }
 0x3cb   :  { %v492_v55 = vmax.f32 %v488_v52, 0.0 }
 0x3d0   :  { %v489_v53 = vpop.f32.mrf.mxu0 }
 0x3d1   :  { %v490_v54 = vadd.f32 %v1056_v51, %v489_v53 }
 0x3d3   :  { %v493_v56 = vmax.f32 %v490_v54, 0.0 }
 0x3d5   :  { %v494_v57 = vpack.c.bf16 %v493_v56, %v492_v55 }
 0x3d7   :  { %571 = vmatmul.bf16.vlgmr.msra.gmra.mxu1 %v494_v57 }
 0x454   :  { %v572_v62 = vpop.f32.mrf.mxu1 }
 0x455   :  { %v573_v0 = vadd.f32 %v1057_v63, %v572_v62 }
 0x457   :  { %v577_v3 = vmax.f32 %v573_v0, 0.0 }
 0x45c   :  { %v574_v1 = vpop.f32.mrf.mxu1 }
 0x45d   :  { %v575_v2 = vadd.f32 %v1057_v63, %v574_v1 }
 0x45f   :  { %v578_v4 = vmax.f32 %v575_v2, 0.0 }
 0x461   :  { %v579_v5 = vpack.c.bf16 %v578_v4, %v577_v3 }
 0x463   :  { %656 = vmatmul.bf16.vlgmr.msra.gmra.mxu2 %v579_v5 }
 0x4e6   :  { %v657_v14 = vpop.f32.mrf.mxu2 }
 0x4e7   :  { %v658_v15 = vadd.f32 %v1058_v11, %v657_v14 }
 0x4e9   :  { %v963_v16 = vmul.f32 -1.442695, %v658_v15 }
 0x4eb   :  { %1068 = vpow2.f32 %v963_v16 }
 0x4ee   :  { %v659_v18 = vpop.f32.mrf.mxu2 }
 0x4ef   :  { %v660_v19 = vadd.f32 %v1058_v11, %v659_v18 }
 0x4f1   :  { %v1069_v20 = vpop.eup %1068  ;;  %v964_v21 = vmul.f32 -1.442695, %v660_v19 }
 0x4f2   :  { %v668_v22 = vadd.f32 1.0, %v1069_v20 }
 0x4f3   :  { %1070 = vpow2.f32 %v964_v21 }
 0x4f4   :  { %1072 = vrcp.f32 %v668_v22  ;;  %vm675_vm4 = vweird.f32 %v668_v22  ;;  %v681_v33 = vand.u32 2147483648, %v668_v22  ;;  %v679_v35 = vand.u32 2147483647, %v668_v22 }
 0x4f6   :  { %v682_v40 = vor.u32 1.1754944e-38, %v681_v33  ;;  %vm680_vm9 = vcmp.eq.f32.partialorder %v679_v35, 8.507059e+37 }
 0x4f9   :  { %v1071_v23 = vpop.eup %1070 }
 0x4fa   :  { %v1073_v24 = vpop.eup %1072  ;;  %v669_v25 = vadd.f32 1.0, %v1071_v23 }
 0x4fb   :  { %v671_v26 = vmul.f32 %v1073_v24, %v668_v22  ;;  %vm676_vm3 = vweird.f32 %v1073_v24 }
 0x4fc   :  { %1074 = vrcp.f32 %v669_v25  ;;  %v696_v34 = vand.u32 2147483648, %v669_v25  ;;  %v694_v37 = vand.u32 2147483647, %v669_v25  ;;  %vm677_vm6 = vmor %vm675_vm4, %vm676_vm3  ;;  %vm690_vm7 = vweird.f32 %v669_v25 }
 0x4fd   :  { %v672_v27 = vsub.f32 1.0, %v671_v26 }
 0x4fe   :  { %v697_v41 = vor.u32 1.1754944e-38, %v696_v34  ;;  %vm695_vm10 = vcmp.eq.f32.partialorder %v694_v37, 8.507059e+37 }
 0x4ff   :  { %v673_v28 = vmul.f32 %v1073_v24, %v672_v27 }
 0x501   :  { %v674_v32 = vadd.f32 %v1073_v24, %v673_v28 }
 0x502   :  { %v1075_v29 = vpop.eup %1074 }
 0x503   :  { %v686_v30 = vmul.f32 %v1075_v29, %v669_v25  ;;  %vm691_vm5 = vweird.f32 %v1075_v29  ;;  %v678_v38 = vsel %vm677_vm6, %v1073_v24, %v674_v32 }
 0x504   :  { %vm692_vm8 = vmor %vm690_vm7, %vm691_vm5  ;;  %v683_v43 = vsel %vm680_vm9, %v682_v40, %v678_v38 }
 0x505   :  { %v687_v31 = vsub.f32 1.0, %v686_v30 }
 0x507   :  { %v688_v36 = vmul.f32 %v1075_v29, %v687_v31 }
 0x509   :  { %v689_v39 = vadd.f32 %v1075_v29, %v688_v36 }
 0x50b   :  { %v693_v42 = vsel %vm692_vm8, %v1075_v29, %v689_v39 }
 0x50c   :  { %v698_v44 = vsel %vm695_vm10, %v697_v41, %v693_v42 }
 0x50d   :  { %v700_v45 = vpack.c.bf16 %v698_v44, %v683_v43 }
 0x50f   :  { %777 = vmatmul.bf16.vlgmr.msra.gmra.mxu3 %v700_v45 }
 0x592   :  { %v778_v47 = vpop.f32.mrf.mxu3 }
 0x593   :  { %v779_v48 = vadd.f32 %v1059_v46, %v778_v47 }
 0x595   :  { %783 = vst.msk [vmem:[#allocation11] sm:$0xff] %vm182_vm0, %v779_v48 }
 0x59a   :  { %v780_v49 = vpop.f32.mrf.mxu3 }
 0x59b   :  { %v781_v50 = vadd.f32 %v1059_v46, %v780_v49 }
 0x59d   :  { %784 = vst.msk [vmem:[#allocation11 + $0x8] sm:$0xff] %vm182_vm0, %v781_v50 }
 0x59e   :  { %797 = dma.vmem_to_hbm [thread:$0]  %s790_s4, 256, %s792_s25, [#allocation4], %s1235_s8, %s1235_s8, %s1236_s18  }
 0x59f   :  { %1226 = dma.done.wait [#allocation4], 256  }
 0x5a0   :  { %1227 = vsyncadd [#allocation4], 4294967040 }
 0x5a1   :  { %802 = vsyncpa [#allocation3], 1 }
 0x5a2   :  { %803 = vsyncpa [#allocation6], 1 }
 0x5a3   :  { %804 = vsyncpa [#allocation9], 1 }
 0x5a4   :  { %805 = vsyncpa [#allocation4], 1 }

</bundles_post_ra>
